<compile_context>
chip_gen: v7x
topology: tpu7x:2x2x1
jax: 0.10.0
libtpu: 0.0.40
codegen_flags: <defaults>
</compile_context>

<pallas_src>
import functools

import jax
import jax.numpy as jnp
from jax.experimental import pallas as pl
from jax.experimental.pallas import tpu as pltpu


# ----------------------------- Pallas kernel ------------------------------- #

def setgnn2_kernel(num_graphs, num_classes, ones_col,
                   x_ref, s_ref, w_ref, out_ref):
    # x_ref: (D, PA) node features, zero-padded, with a ones-lane at column `ones_col`.
    # s_ref: (3, D, D) stacked structure matrices [S_v2e | S_e2v | pool], zero-padded.
    # w_ref: (10, PA, PA) stacked bias-augmented weights; static indices pick a layer.
    def lin(h, i):
        # Bias is folded into row `ones_col` of the augmented weight, so one MXU dot
        # implements h @ W + b and propagates the ones-lane (W_aug[ones,ones] = 1).
        return jnp.dot(h, w_ref[i], preferred_element_type=jnp.float32)

    def mlp2(h, i):
        # 2-layer MLP (Linear -> ReLU -> Linear) + the conv's trailing F.relu.
        h = jnp.maximum(lin(h, i), 0.0)
        return jnp.maximum(lin(h, i + 1), 0.0)

    def restore_ones(h):
        # Incidence matmuls replace the ones-lane with row-sums of S; re-pin it so
        # the folded biases of the following layers stay exact.  (Cheap VPU op.)
        col = jax.lax.broadcasted_iota(jnp.int32, h.shape, dimension=1)
        return jnp.where(col == ones_col, 1.0, h)

    # ---------------- V2EConv (HalfNLHconv, attention=False) ----------------
    h = mlp2(x_ref[...], 0)                                              # relu(f_enc(x))
    h = restore_ones(jnp.dot(s_ref[0], h, preferred_element_type=jnp.float32))
    h = mlp2(h, 2)                                                       # relu(f_dec(.))

    # ---------------- E2VConv (reversed edge index) --------------------------
    h = mlp2(h, 4)                                                       # relu(f_enc'(h))
    h = restore_ones(jnp.dot(s_ref[1], h, preferred_element_type=jnp.float32))
    h = mlp2(h, 6)                                                       # relu(f_dec'(.))

    # ---------------- classifier + global_mean_pool (reassociated) -----------
    h = jnp.maximum(lin(h, 8), 0.0)                                      # classifier hidden
    # Pool first: each pool row sums to 1, so the final affine layer commutes with
    # mean-pooling and its folded bias passes through exactly (zero-padded pool rows
    # have a 0 ones-lane, so they receive no bias either).
    g = jnp.dot(s_ref[2], h, preferred_element_type=jnp.float32)
    g = lin(g, 9)

    # ---------------- slice real graphs/classes + log_softmax ----------------
    g = g[:num_graphs, :num_classes]        # strip zero-padded rows / class columns
    m = jnp.max(g, axis=1, keepdims=True)
    z = g - m
    out_ref[...] = z - jnp.log(jnp.sum(jnp.exp(z), axis=1, keepdims=True))


def setgnn2_forward(x_aug, struct_slab, w_slab, num_graphs, num_classes):
    d = struct_slab.shape[1]
    pa = w_slab.shape[1]
    inputs = (x_aug, struct_slab, w_slab)

    # Advisory cost estimate: 10 augmented linears on D rows + 3 structure matmuls.
    flops = 10 * 2 * d * pa * pa + 3 * 2 * d * d * pa
    bytes_accessed = (sum(a.size * a.dtype.itemsize for a in inputs)
                      + num_graphs * num_classes * 4)
    cost = pl.CostEstimate(flops=flops,
                           transcendentals=num_graphs * (num_classes + 1),
                           bytes_accessed=bytes_accessed)

    kernel = functools.partial(setgnn2_kernel, num_graphs, num_classes, pa - 1)
    return pl.pallas_call(
        kernel,
        out_shape=jax.ShapeDtypeStruct((num_graphs, num_classes), jnp.float32),
        # Tiny problem: every operand fits in VMEM as one full block (no grid).
        in_specs=[pl.BlockSpec(memory_space=pltpu.MemorySpace.VMEM)
                  for _ in inputs],
        out_specs=pl.BlockSpec(memory_space=pltpu.MemorySpace.VMEM),
        cost_estimate=cost,
    )(*inputs)


# --------------------------- operand packing -------------------------------- #

def pack_weights(params, width):
    """Fold the 10 (W, b) pairs into one (10, width+1, width+1) bias-augmented slab."""
    pa = width + 1
    slabs = []
    for i in range(0, len(params), 2):
        w, b = params[i], params[i + 1].reshape(-1)
        in_d, out_d = w.shape
        assert in_d <= width and out_d <= width
        w_aug = jnp.zeros((pa, pa), jnp.float32)
        w_aug = w_aug.at[:in_d, :out_d].set(w)
        w_aug = w_aug.at[width, :out_d].set(b)       # bias row
        w_aug = w_aug.at[width, width].set(1.0)      # ones-lane passthrough
        slabs.append(w_aug)
    return jnp.stack(slabs)


def pack_structs(mats, d):
    """Zero-pad [S_v2e, S_e2v, pool] to a common (d, d) and stack -> (3, d, d).

    Zero contraction columns exactly annihilate the padded / garbage rows of the
    activations, so the padding contributes 0.0 to every dot product."""
    padded = [jnp.pad(m, ((0, d - m.shape[0]), (0, d - m.shape[1]))) for m in mats]
    return jnp.stack(padded)


def pack_x(x, d, width):
    """Zero-pad x to (d, width+1) and set the ones-lane (column `width`) to 1."""
    x_aug = jnp.zeros((d, width + 1), jnp.float32)
    x_aug = x_aug.at[:x.shape[0], :x.shape[1]].set(x)
    x_aug = x_aug.at[:, width].set(1.0)
    return x_aug


# ----------------------------- JAX reference -------------------------------- #

def reference_forward(x, s_v2e, s_e2v, pool, params):
    (v2e_e_w0, v2e_e_b0, v2e_e_w1, v2e_e_b1,
     v2e_d_w0, v2e_d_b0, v2e_d_w1, v2e_d_b1,
     e2v_e_w0, e2v_e_b0, e2v_e_w1, e2v_e_b1,
     e2v_d_w0, e2v_d_b0, e2v_d_w1, e2v_d_b1,
     clf_w0, clf_b0, clf_w1, clf_b1) = params

    def mlp(h, w0, b0, w1, b1):
        return jnp.maximum(h @ w0 + b0, 0.0) @ w1 + b1

    h = jnp.maximum(mlp(x, v2e_e_w0, v2e_e_b0, v2e_e_w1, v2e_e_b1), 0.0)
    h = s_v2e @ h
    h = jnp.maximum(mlp(h, v2e_d_w0, v2e_d_b0, v2e_d_w1, v2e_d_b1), 0.0)
    h = jnp.maximum(mlp(h, e2v_e_w0, e2v_e_b0, e2v_e_w1, e2v_e_b1), 0.0)
    h = s_e2v @ h
    h = jnp.maximum(mlp(h, e2v_d_w0, e2v_d_b0, e2v_d_w1, e2v_d_b1), 0.0)
    h = mlp(h, clf_w0, clf_b0, clf_w1, clf_b1)
    g = pool @ h
    return jax.nn.log_softmax(g, axis=1)


# ----------------------------- Setup / main ---------------------------------- #

def glorot(key, shape):
    fan_in, fan_out = shape
    std = (2.0 / (fan_in + fan_out)) ** 0.5
    return std * jax.random.normal(key, shape, dtype=jnp.float32)


if __name__ == "__main__":
    # Small synthetic hypergraph sizes.
    N = 24          # number of nodes (3 graphs x 8 nodes)
    M = 12          # number of hyperedges (already zero-based, so cidx shift is a no-op)
    E = 48          # number of (node, hyperedge) incidence pairs
    F_IN = 16       # args.num_features
    H = 32          # args.MLP_hidden
    CH = 32         # args.Classifier_hidden
    C = 5           # args.num_classes
    G = 3           # number of graphs in the batch

    key = jax.random.PRNGKey(0)
    keys = jax.random.split(key, 32)

    # data.x
    x = jax.random.normal(keys[0], (N, F_IN), dtype=jnp.float32)
    # data.edge_index (2, E): row0 = node ids, row1 = hyperedge ids (zero-based)
    nodes = jax.random.randint(keys[1], (E,), 0, N)
    hedges = jax.random.randint(keys[2], (E,), 0, M)
    # data.norm: per-incidence edge weight
    norm = jax.random.uniform(keys[3], (E,), dtype=jnp.float32, minval=0.5, maxval=1.5)
    # data.batch: node -> graph id
    batch = jnp.repeat(jnp.arange(G), N // G)

    # Dense weighted incidence matrices (exact scatter_add, aggr='add').
    s_v2e = jnp.zeros((M, N), jnp.float32).at[hedges, nodes].add(norm)
    s_e2v = jnp.zeros((N, M), jnp.float32).at[nodes, hedges].add(norm)

    # global_mean_pool matrix: P[g, n] = 1/|graph g| if batch[n] == g (rows sum to 1)
    counts = jnp.zeros((G,), jnp.float32).at[batch].add(1.0)
    pool = (jax.nn.one_hot(batch, G, dtype=jnp.float32).T) / counts[:, None]

    # Deterministic parameter init (MLP_num_layers=2, Classifier_num_layers=2).
    params = (
        # V2EConv.f_enc: MLP(F_IN -> H -> H)
        glorot(keys[4], (F_IN, H)), jnp.zeros((1, H), jnp.float32),
        glorot(keys[5], (H, H)),    jnp.zeros((1, H), jnp.float32),
        # V2EConv.f_dec: MLP(H -> H -> H)
        glorot(keys[6], (H, H)),    jnp.zeros((1, H), jnp.float32),
        glorot(keys[7], (H, H)),    jnp.zeros((1, H), jnp.float32),
        # E2VConv.f_enc: MLP(H -> H -> H)
        glorot(keys[8], (H, H)),    jnp.zeros((1, H), jnp.float32),
        glorot(keys[9], (H, H)),    jnp.zeros((1, H), jnp.float32),
        # E2VConv.f_dec: MLP(H -> H -> H)
        glorot(keys[10], (H, H)),   jnp.zeros((1, H), jnp.float32),
        glorot(keys[11], (H, H)),   jnp.zeros((1, H), jnp.float32),
        # classifier: MLP(H -> CH -> C)
        glorot(keys[12], (H, CH)),  jnp.zeros((1, CH), jnp.float32),
        glorot(keys[13], (CH, C)),  jnp.zeros((1, C), jnp.float32),
    )

    # Consolidate everything into 3 kernel operands:
    #   x_aug       (D, WIDTH+1)   padded features + ones-lane
    #   struct_slab (3, D, D)      [S_v2e | S_e2v | pool], zero-padded
    #   w_slab      (10, WIDTH+1, WIDTH+1)   bias-augmented weights
    WIDTH = H
    assert F_IN <= WIDTH and CH == WIDTH and C <= WIDTH
    D = max(N, M, G)
    x_aug = pack_x(x, D, WIDTH)
    struct_slab = pack_structs([s_v2e, s_e2v, pool], D)
    w_slab = pack_weights(params, WIDTH)

    out = setgnn2_forward(x_aug, struct_slab, w_slab, G, C)
    out = jax.block_until_ready(out)

    ref = reference_forward(x, s_v2e, s_e2v, pool, params)
    assert out.shape == (G, C)
    assert jnp.allclose(out, ref, atol=1e-4, rtol=1e-4), (out, ref)

    print("KERNEL_OK")
</pallas_src>

<mosaic_0001>
module attributes {stable_mosaic.version = 11 : i64} {
  func.func @setgnn2_kernel(%arg0: memref<24x33xf32, #tpu.memory_space<vmem>>, %arg1: memref<3x24x24xf32, #tpu.memory_space<vmem>>, %arg2: memref<10x33x33xf32, #tpu.memory_space<vmem>>, %arg3: memref<3x5xf32, #tpu.memory_space<vmem>>) attributes {dimension_semantics = [], scalar_prefetch = 0 : i64, scratch_operands = 0 : i64, tpu.core_type = #tpu.core_type<tc>} {
    %c0 = arith.constant 0 : index
    %c0_0 = arith.constant 0 : index
    %0 = vector.load %arg0[%c0, %c0_0] : memref<24x33xf32, #tpu.memory_space<vmem>>, vector<24x33xf32>
    %c0_1 = arith.constant 0 : index
    %c0_2 = arith.constant 0 : index
    %c0_3 = arith.constant 0 : index
    %1 = vector.load %arg2[%c0_1, %c0_2, %c0_3] : memref<10x33x33xf32, #tpu.memory_space<vmem>>, vector<1x33x33xf32>
    %2 = vector.shape_cast %1 : vector<1x33x33xf32> to vector<33x33xf32>
    %cst = arith.constant dense<0.000000e+00> : vector<24x33xf32>
    %3 = tpu.matmul %0, %2, %cst {dimension_numbers = #tpu.dot_dimension_numbers<[1], [0], [0], [1], [0, 0, 1, 1], [], []>} : vector<24x33xf32>, vector<33x33xf32>, vector<24x33xf32> -> vector<24x33xf32>
    %cst_4 = arith.constant 0.000000e+00 : f32
    %4 = vector.broadcast %cst_4 : f32 to vector<24x33xf32>
    %5 = arith.maximumf %3, %4 : vector<24x33xf32>
    %c1 = arith.constant 1 : index
    %c0_5 = arith.constant 0 : index
    %c0_6 = arith.constant 0 : index
    %6 = vector.load %arg2[%c1, %c0_5, %c0_6] : memref<10x33x33xf32, #tpu.memory_space<vmem>>, vector<1x33x33xf32>
    %7 = vector.shape_cast %6 : vector<1x33x33xf32> to vector<33x33xf32>
    %cst_7 = arith.constant dense<0.000000e+00> : vector<24x33xf32>
    %8 = tpu.matmul %5, %7, %cst_7 {dimension_numbers = #tpu.dot_dimension_numbers<[1], [0], [0], [1], [0, 0, 1, 1], [], []>} : vector<24x33xf32>, vector<33x33xf32>, vector<24x33xf32> -> vector<24x33xf32>
    %cst_8 = arith.constant 0.000000e+00 : f32
    %9 = vector.broadcast %cst_8 : f32 to vector<24x33xf32>
    %10 = arith.maximumf %8, %9 : vector<24x33xf32>
    %c0_9 = arith.constant 0 : index
    %c0_10 = arith.constant 0 : index
    %c0_11 = arith.constant 0 : index
    %11 = vector.load %arg1[%c0_9, %c0_10, %c0_11] : memref<3x24x24xf32, #tpu.memory_space<vmem>>, vector<1x24x24xf32>
    %12 = vector.shape_cast %11 : vector<1x24x24xf32> to vector<24x24xf32>
    %cst_12 = arith.constant dense<0.000000e+00> : vector<24x33xf32>
    %13 = tpu.matmul %12, %10, %cst_12 {dimension_numbers = #tpu.dot_dimension_numbers<[1], [0], [0], [1], [0, 0, 1, 1], [], []>} : vector<24x24xf32>, vector<24x33xf32>, vector<24x33xf32> -> vector<24x33xf32>
    %14 = tpu.iota {dimensions = array<i32: 1>} : vector<24x33xi32>
    %c32_i32 = arith.constant 32 : i32
    %15 = vector.broadcast %c32_i32 : i32 to vector<24x33xi32>
    %16 = arith.cmpi eq, %14, %15 : vector<24x33xi32>
    %cst_13 = arith.constant 1.000000e+00 : f32
    %17 = vector.broadcast %cst_13 : f32 to vector<24x33xf32>
    %18 = arith.select %16, %17, %13 : vector<24x33xi1>, vector<24x33xf32>
    %c2 = arith.constant 2 : index
    %c0_14 = arith.constant 0 : index
    %c0_15 = arith.constant 0 : index
    %19 = vector.load %arg2[%c2, %c0_14, %c0_15] : memref<10x33x33xf32, #tpu.memory_space<vmem>>, vector<1x33x33xf32>
    %20 = vector.shape_cast %19 : vector<1x33x33xf32> to vector<33x33xf32>
    %cst_16 = arith.constant dense<0.000000e+00> : vector<24x33xf32>
    %21 = tpu.matmul %18, %20, %cst_16 {dimension_numbers = #tpu.dot_dimension_numbers<[1], [0], [0], [1], [0, 0, 1, 1], [], []>} : vector<24x33xf32>, vector<33x33xf32>, vector<24x33xf32> -> vector<24x33xf32>
    %cst_17 = arith.constant 0.000000e+00 : f32
    %22 = vector.broadcast %cst_17 : f32 to vector<24x33xf32>
    %23 = arith.maximumf %21, %22 : vector<24x33xf32>
    %c3 = arith.constant 3 : index
    %c0_18 = arith.constant 0 : index
    %c0_19 = arith.constant 0 : index
    %24 = vector.load %arg2[%c3, %c0_18, %c0_19] : memref<10x33x33xf32, #tpu.memory_space<vmem>>, vector<1x33x33xf32>
    %25 = vector.shape_cast %24 : vector<1x33x33xf32> to vector<33x33xf32>
    %cst_20 = arith.constant dense<0.000000e+00> : vector<24x33xf32>
    %26 = tpu.matmul %23, %25, %cst_20 {dimension_numbers = #tpu.dot_dimension_numbers<[1], [0], [0], [1], [0, 0, 1, 1], [], []>} : vector<24x33xf32>, vector<33x33xf32>, vector<24x33xf32> -> vector<24x33xf32>
    %cst_21 = arith.constant 0.000000e+00 : f32
    %27 = vector.broadcast %cst_21 : f32 to vector<24x33xf32>
    %28 = arith.maximumf %26, %27 : vector<24x33xf32>
    %c4 = arith.constant 4 : index
    %c0_22 = arith.constant 0 : index
    %c0_23 = arith.constant 0 : index
    %29 = vector.load %arg2[%c4, %c0_22, %c0_23] : memref<10x33x33xf32, #tpu.memory_space<vmem>>, vector<1x33x33xf32>
    %30 = vector.shape_cast %29 : vector<1x33x33xf32> to vector<33x33xf32>
    %cst_24 = arith.constant dense<0.000000e+00> : vector<24x33xf32>
    %31 = tpu.matmul %28, %30, %cst_24 {dimension_numbers = #tpu.dot_dimension_numbers<[1], [0], [0], [1], [0, 0, 1, 1], [], []>} : vector<24x33xf32>, vector<33x33xf32>, vector<24x33xf32> -> vector<24x33xf32>
    %cst_25 = arith.constant 0.000000e+00 : f32
    %32 = vector.broadcast %cst_25 : f32 to vector<24x33xf32>
    %33 = arith.maximumf %31, %32 : vector<24x33xf32>
    %c5 = arith.constant 5 : index
    %c0_26 = arith.constant 0 : index
    %c0_27 = arith.constant 0 : index
    %34 = vector.load %arg2[%c5, %c0_26, %c0_27] : memref<10x33x33xf32, #tpu.memory_space<vmem>>, vector<1x33x33xf32>
    %35 = vector.shape_cast %34 : vector<1x33x33xf32> to vector<33x33xf32>
    %cst_28 = arith.constant dense<0.000000e+00> : vector<24x33xf32>
    %36 = tpu.matmul %33, %35, %cst_28 {dimension_numbers = #tpu.dot_dimension_numbers<[1], [0], [0], [1], [0, 0, 1, 1], [], []>} : vector<24x33xf32>, vector<33x33xf32>, vector<24x33xf32> -> vector<24x33xf32>
    %cst_29 = arith.constant 0.000000e+00 : f32
    %37 = vector.broadcast %cst_29 : f32 to vector<24x33xf32>
    %38 = arith.maximumf %36, %37 : vector<24x33xf32>
    %c1_30 = arith.constant 1 : index
    %c0_31 = arith.constant 0 : index
    %c0_32 = arith.constant 0 : index
    %39 = vector.load %arg1[%c1_30, %c0_31, %c0_32] : memref<3x24x24xf32, #tpu.memory_space<vmem>>, vector<1x24x24xf32>
    %40 = vector.shape_cast %39 : vector<1x24x24xf32> to vector<24x24xf32>
    %cst_33 = arith.constant dense<0.000000e+00> : vector<24x33xf32>
    %41 = tpu.matmul %40, %38, %cst_33 {dimension_numbers = #tpu.dot_dimension_numbers<[1], [0], [0], [1], [0, 0, 1, 1], [], []>} : vector<24x24xf32>, vector<24x33xf32>, vector<24x33xf32> -> vector<24x33xf32>
    %42 = tpu.iota {dimensions = array<i32: 1>} : vector<24x33xi32>
    %c32_i32_34 = arith.constant 32 : i32
    %43 = vector.broadcast %c32_i32_34 : i32 to vector<24x33xi32>
    %44 = arith.cmpi eq, %42, %43 : vector<24x33xi32>
    %cst_35 = arith.constant 1.000000e+00 : f32
    %45 = vector.broadcast %cst_35 : f32 to vector<24x33xf32>
    %46 = arith.select %44, %45, %41 : vector<24x33xi1>, vector<24x33xf32>
    %c6 = arith.constant 6 : index
    %c0_36 = arith.constant 0 : index
    %c0_37 = arith.constant 0 : index
    %47 = vector.load %arg2[%c6, %c0_36, %c0_37] : memref<10x33x33xf32, #tpu.memory_space<vmem>>, vector<1x33x33xf32>
    %48 = vector.shape_cast %47 : vector<1x33x33xf32> to vector<33x33xf32>
    %cst_38 = arith.constant dense<0.000000e+00> : vector<24x33xf32>
    %49 = tpu.matmul %46, %48, %cst_38 {dimension_numbers = #tpu.dot_dimension_numbers<[1], [0], [0], [1], [0, 0, 1, 1], [], []>} : vector<24x33xf32>, vector<33x33xf32>, vector<24x33xf32> -> vector<24x33xf32>
    %cst_39 = arith.constant 0.000000e+00 : f32
    %50 = vector.broadcast %cst_39 : f32 to vector<24x33xf32>
    %51 = arith.maximumf %49, %50 : vector<24x33xf32>
    %c7 = arith.constant 7 : index
    %c0_40 = arith.constant 0 : index
    %c0_41 = arith.constant 0 : index
    %52 = vector.load %arg2[%c7, %c0_40, %c0_41] : memref<10x33x33xf32, #tpu.memory_space<vmem>>, vector<1x33x33xf32>
    %53 = vector.shape_cast %52 : vector<1x33x33xf32> to vector<33x33xf32>
    %cst_42 = arith.constant dense<0.000000e+00> : vector<24x33xf32>
    %54 = tpu.matmul %51, %53, %cst_42 {dimension_numbers = #tpu.dot_dimension_numbers<[1], [0], [0], [1], [0, 0, 1, 1], [], []>} : vector<24x33xf32>, vector<33x33xf32>, vector<24x33xf32> -> vector<24x33xf32>
    %cst_43 = arith.constant 0.000000e+00 : f32
    %55 = vector.broadcast %cst_43 : f32 to vector<24x33xf32>
    %56 = arith.maximumf %54, %55 : vector<24x33xf32>
    %c8 = arith.constant 8 : index
    %c0_44 = arith.constant 0 : index
    %c0_45 = arith.constant 0 : index
    %57 = vector.load %arg2[%c8, %c0_44, %c0_45] : memref<10x33x33xf32, #tpu.memory_space<vmem>>, vector<1x33x33xf32>
    %58 = vector.shape_cast %57 : vector<1x33x33xf32> to vector<33x33xf32>
    %cst_46 = arith.constant dense<0.000000e+00> : vector<24x33xf32>
    %59 = tpu.matmul %56, %58, %cst_46 {dimension_numbers = #tpu.dot_dimension_numbers<[1], [0], [0], [1], [0, 0, 1, 1], [], []>} : vector<24x33xf32>, vector<33x33xf32>, vector<24x33xf32> -> vector<24x33xf32>
    %cst_47 = arith.constant 0.000000e+00 : f32
    %60 = vector.broadcast %cst_47 : f32 to vector<24x33xf32>
    %61 = arith.maximumf %59, %60 : vector<24x33xf32>
    %c2_48 = arith.constant 2 : index
    %c0_49 = arith.constant 0 : index
    %c0_50 = arith.constant 0 : index
    %62 = vector.load %arg1[%c2_48, %c0_49, %c0_50] : memref<3x24x24xf32, #tpu.memory_space<vmem>>, vector<1x24x24xf32>
    %63 = vector.shape_cast %62 : vector<1x24x24xf32> to vector<24x24xf32>
    %cst_51 = arith.constant dense<0.000000e+00> : vector<24x33xf32>
    %64 = tpu.matmul %63, %61, %cst_51 {dimension_numbers = #tpu.dot_dimension_numbers<[1], [0], [0], [1], [0, 0, 1, 1], [], []>} : vector<24x24xf32>, vector<24x33xf32>, vector<24x33xf32> -> vector<24x33xf32>
    %c9 = arith.constant 9 : index
    %c0_52 = arith.constant 0 : index
    %c0_53 = arith.constant 0 : index
    %65 = vector.load %arg2[%c9, %c0_52, %c0_53] : memref<10x33x33xf32, #tpu.memory_space<vmem>>, vector<1x33x33xf32>
    %66 = vector.shape_cast %65 : vector<1x33x33xf32> to vector<33x33xf32>
    %cst_54 = arith.constant dense<0.000000e+00> : vector<24x33xf32>
    %67 = tpu.matmul %64, %66, %cst_54 {dimension_numbers = #tpu.dot_dimension_numbers<[1], [0], [0], [1], [0, 0, 1, 1], [], []>} : vector<24x33xf32>, vector<33x33xf32>, vector<24x33xf32> -> vector<24x33xf32>
    %68 = vector.extract_strided_slice %67 {offsets = [0, 0], sizes = [3, 5], strides = [1, 1]} : vector<24x33xf32> to vector<3x5xf32>
    %cst_55 = arith.constant dense<0xFF800000> : vector<3xf32>
    %69 = vector.multi_reduction <maximumf>, %68, %cst_55 [1] : vector<3x5xf32> to vector<3xf32>
    %70 = vector.shape_cast %69 : vector<3xf32> to vector<3x1xf32>
    %71 = vector.broadcast %70 : vector<3x1xf32> to vector<3x5xf32>
    %72 = arith.subf %68, %71 : vector<3x5xf32>
    %73 = math.exp %72 : vector<3x5xf32>
    %cst_56 = arith.constant dense<0.000000e+00> : vector<3xf32>
    %74 = vector.multi_reduction <add>, %73, %cst_56 [1] : vector<3x5xf32> to vector<3xf32>
    %75 = vector.shape_cast %74 : vector<3xf32> to vector<3x1xf32>
    %76 = math.log %75 : vector<3x1xf32>
    %77 = vector.broadcast %76 : vector<3x1xf32> to vector<3x5xf32>
    %78 = arith.subf %72, %77 : vector<3x5xf32>
    %c0_57 = arith.constant 0 : index
    %c0_58 = arith.constant 0 : index
    %79 = vector.load %arg3[%c0_57, %c0_58] : memref<3x5xf32, #tpu.memory_space<vmem>>, vector<3x5xf32>
    tpu.vector_store %arg3[%c0_57, %c0_58], %78 {strides = array<i32>} : memref<3x5xf32, #tpu.memory_space<vmem>>, vector<3x5xf32>,
    return
  }
}

</mosaic_0001>

<bundles_post_ra>
// kernel: tpu_custom_call.1
= control target key start
LH: loop header
LB: loop body
LE: loop exit
PB: predicated region body
PF: predicated region fallthrough
CT: control target
= control target key end

     0   :  { %8 = vsyncpa [#allocation3], 0  ;;  %s2225_s0 = inlined_call_operand.hbm [shape: f32[24,33], index: 0, kind: input, shape index: {}]   ;;  %s2226_s1 = inlined_call_operand.hbm [shape: f32[3,24,24], index: 1, kind: input, shape index: {}]   ;;  %s2227_s2 = inlined_call_operand.hbm [shape: f32[10,33,33], index: 2, kind: input, shape index: {}]   ;;  %s2228_s3 = inlined_call_operand.hbm [shape: f32[3,5], index: 3, kind: output, shape index: {}]  }
   0x1   :  { %9 = vsyncpa [#allocation6], 0 }
   0x2   :  { %10 = vsyncpa [#allocation4], 0  ;;  %s1947_s12 = smov [#allocation5]   ;;  %s1948_s14 = smov [#allocation2]  }
   0x3   :  { %s28_s13 = sshll.u32 %s1947_s12, 4  ;;  %s16_s15 = sshll.u32 %s1948_s14, 4  ;;  %s29_s13 = int_to_ptr.vmem [resolvable:$true] %s28_s13  ;;  %s1976_s15 = int_to_ptr.vmem [resolvable:$true] %s16_s15 }
   0x4   :  { %s1853_s18 = scalar_lea.hbm %s2226_s1, 1152 }
   0x5   :  { %p1854_p0 = scmp.ne.s32.totalorder %s2226_s1, %s1853_s18  ;;  %p1857_p1 = scmp.lt.u32.totalorder %s1853_s18, %s2226_s1 }
   0x7   :  { %p1859_p2 = pnand %p1857_p1, %p1854_p0 }
   0x9   :  { %1862 = shalt.err (!%p1859_p2)
}
   0xa   :  { %s1863_s23 = scalar_lea.vmem %s29_s13, 1152  ;;  %p1868_p4 = scmp.lt.s32.totalorder %s29_s13, %s29_s13 }
   0xb   :  { %p1864_p3 = scmp.ne.s32.totalorder %s29_s13, %s1863_s23  ;;  %p1869_p5 = scmp.lt.s32.totalorder %s1863_s23, %s1863_s23 }
   0xd   :  { %p1870_p6 = por %p1869_p5, %p1868_p4 }
   0xf   :  { %p1871_p7 = pnand %p1870_p6, %p1864_p3 }
  0x11   :  { %1874 = shalt.err (!%p1871_p7)
}
  0x12   :  { %s1949_s24 = smov 128   ;;  %s1950_s25 = smov 8  }
  0x13   :  { %34 = dma.hbm_to_vmem [thread:$0]  %s2226_s1, 1152, %s29_s13, [#allocation6], %s1949_s24, %s1949_s24, %s1950_s25  }
  0x14   :  { %s1875_s30 = scalar_lea.hbm %s2225_s0, 384 }
  0x15   :  { %p1876_p8 = scmp.ne.s32.totalorder %s2225_s0, %s1875_s30  ;;  %p1879_p9 = scmp.lt.u32.totalorder %s1875_s30, %s2225_s0 }
  0x17   :  { %p1881_p10 = pnand %p1879_p9, %p1876_p8 }
  0x19   :  { %1884 = shalt.err (!%p1881_p10)
}
  0x1a   :  { %s1885_s8 = scalar_lea.vmem %s1976_s15, 384  ;;  %p1890_p12 = scmp.lt.s32.totalorder %s1976_s15, %s1976_s15 }
  0x1b   :  { %p1886_p11 = scmp.ne.s32.totalorder %s1976_s15, %s1885_s8  ;;  %p1891_p13 = scmp.lt.s32.totalorder %s1885_s8, %s1885_s8 }
  0x1d   :  { %p1892_p0 = por %p1891_p13, %p1890_p12 }
  0x1f   :  { %p1893_p1 = pnand %p1892_p0, %p1886_p11 }
  0x21   :  { %1896 = shalt.err (!%p1893_p1)
}
  0x22   :  { %22 = dma.hbm_to_vmem [thread:$0]  %s2225_s0, 384, %s1976_s15, [#allocation3], %s1949_s24, %s1949_s24, %s1950_s25  }
  0x23   :  { %s1951_s10 = smov [#allocation7]   ;;  %s1897_s14 = scalar_lea.hbm %s2227_s2, 6400 }
  0x24   :  { %s40_s11 = sshll.u32 %s1951_s10, 4  ;;  %p1898_p2 = scmp.ne.s32.totalorder %s2227_s2, %s1897_s14  ;;  %s41_s11 = int_to_ptr.vmem [resolvable:$true] %s40_s11 }
  0x25   :  { %p1901_p3 = scmp.lt.u32.totalorder %s1897_s14, %s2227_s2 }
  0x27   :  { %p1903_p4 = pnand %p1901_p3, %p1898_p2 }
  0x29   :  { %1906 = shalt.err (!%p1903_p4)
}
  0x2a   :  { %s1907_s20 = scalar_lea.vmem %s41_s11, 6400  ;;  %p1912_p6 = scmp.lt.s32.totalorder %s41_s11, %s41_s11 }
  0x2b   :  { %p1908_p5 = scmp.ne.s32.totalorder %s41_s11, %s1907_s20  ;;  %p1913_p7 = scmp.lt.s32.totalorder %s1907_s20, %s1907_s20 }
  0x2d   :  { %p1914_p8 = por %p1913_p7, %p1912_p6 }
  0x2f   :  { %p1915_p9 = pnand %p1914_p8, %p1908_p5 }
  0x31   :  { %1918 = shalt.err (!%p1915_p9)
}
  0x32   :  { %46 = dma.hbm_to_vmem [thread:$0]  %s2227_s2, 6400, %s41_s11, [#allocation6], %s1949_s24, %s1949_s24, %s1950_s25  }
  0x33   :  { %1941 = dma.done.wait [#allocation3], 384  }
  0x34   :  { %1942 = vsyncadd [#allocation3], 4294966912 }
  0x35   :  { %1943 = dma.done.wait [#allocation6], 7552  }
  0x36   :  { %1944 = vsyncadd [#allocation6], 4294959744  ;;  %v1952_v0 = vmov 0.0|0.0   ;;  %vm1953_vm0 = vmmov 0   ;;  %v1954_v1 = vmov 0.0   ;;  %v59_v2 = vld [vmem:[#allocation7] sm:$0xff]  ;;  %v355_v54 = vlaneseq }
  0x37   :  { %1765 = vmatprep.subr.bf16.mxu0 %v1952_v0  ;;  %1540 = vmatprep.mubr.msk.f32.mxu0 %vm1953_vm0, %v1954_v1  ;;  %v60_v3 = vld [vmem:[#allocation7 + $0x8] sm:$0xff]  ;;  %v61_v4 = vld [vmem:[#allocation7 + $0x10] sm:$0xff]  ;;  %v62_v6 = vld [vmem:[#allocation7 + $0x18] sm:$0xff]  ;;  %vm74_vm1 = vcmask 1040384   ;;  %vm64_vm2 = vcmask 269312   ;;  %vm265_vm3 = vcmask 195584  }
  0x38   :  { %1771 = vmatprep.subr.bf16.mxu1 %v1952_v0  ;;  %1559 = vmatprep.mubr.msk.f32.mxu1 %vm1953_vm0, %v1954_v1  ;;  %v1766_v5 = vpack.c.bf16 %v60_v3, %v59_v2  ;;  %v162_v7 = vld [vmem:[#allocation7 + $0x28] sm:$0xff]  ;;  %v1769_v8 = vpack.c.bf16 %v62_v6, %v61_v4  ;;  %v163_v9 = vld [vmem:[#allocation7 + $0x30] sm:$0xff]  ;;  %v164_v10 = vld [vmem:[#allocation7 + $0x38] sm:$0xff]  ;;  %v2077_v55 = vand.u32 127, %v355_v54  ;;  %vm1353_vm5 = vcmask 34816   ;;  %s1955_s2 = smov [#allocation8]  }
  0x39   :  { %v165_v11 = vld [vmem:[#allocation7 + $0x40] sm:$0xff]  ;;  %v1772_v12 = vpack.c.bf16 %v163_v9, %v162_v7  ;;  %v57_v16 = vld [vmem:[#allocation2 + $0x8] sm:$0xff]  ;;  %v58_v17 = vld [vmem:[#allocation2 + $0x10] sm:$0xff]  ;;  %s1373_s21 = sshll.u32 %s1955_s2, 4  ;;  %s1374_s21 = int_to_ptr.vmem [resolvable:$true] %s1373_s21 }
  0x3a   :  { %1767 = vmatpush3.bf16.msra.mxu0 %v1766_v5  ;;  %v1775_v13 = vpack.c.bf16 %v165_v11, %v164_v10  ;;  %v63_v14 = vld [vmem:[#allocation7 + $0x20] sm:$0x1]  ;;  %v166_v18 = vld [vmem:[#allocation7 + $0x48] sm:$0x1]  ;;  %v362_v28 = vld [vmem:[#allocation7 + $0x50] sm:$0xff]  ;;  %vm357_vm4 = vcmp.eq.s32.totalorder %v2077_v55, 32  ;;  %p1924_p11 = scmp.lt.s32.totalorder %s1374_s21, %s1374_s21 }
  0x3b   :  { %1768 = vmatprep.subr.bf16.mxu0 %v1952_v0  ;;  %1773 = vmatpush3.bf16.msra.mxu1 %v1772_v12  ;;  %v56_v15 = vld [vmem:[#allocation2] sm:$0xff]  ;;  %v363_v29 = vld [vmem:[#allocation7 + $0x58] sm:$0xff]  ;;  %v365_v32 = vld [vmem:[#allocation7 + $0x68] sm:$0xff]  ;;  %s1919_s22 = scalar_lea.vmem %s1374_s21, 64 }
  0x3c   :  { %1774 = vmatprep.subr.bf16.mxu1 %v1952_v0  ;;  %v364_v30 = vld [vmem:[#allocation7 + $0x60] sm:$0xff]  ;;  %v1781_v31 = vpack.c.bf16 %v363_v29, %v362_v28  ;;  %v262_v44 = vld [vmem:[#allocation5] sm:$0xff]  ;;  %v264_v46 = vld [vmem:[#allocation5 + $0x10] sm:$0xff]  ;;  %p1920_p10 = scmp.ne.s32.totalorder %s1374_s21, %s1919_s22  ;;  %p1925_p12 = scmp.lt.s32.totalorder %s1919_s22, %s1919_s22 }
  0x3d   :  { %v1784_v33 = vpack.c.bf16 %v365_v32, %v364_v30  ;;  %v263_v45 = vld [vmem:[#allocation5 + $0x8] sm:$0xff]  ;;  %v366_v47 = vld [vmem:[#allocation7 + $0x70] sm:$0x1]  ;;  %v463_v48 = vld [vmem:[#allocation7 + $0x78] sm:$0xff] }
  0x3e   :  { %1770 = vmatpush3.bf16.msra.mxu0 %v1769_v8  ;;  %v464_v49 = vld [vmem:[#allocation7 + $0x80] sm:$0xff]  ;;  %v465_v50 = vld [vmem:[#allocation7 + $0x88] sm:$0xff]  ;;  %v466_v52 = vld [vmem:[#allocation7 + $0x90] sm:$0xff]  ;;  %p1926_p13 = por %p1925_p12, %p1924_p11 }
  0x3f   :  { %1538 = vmatprep.subr.mxu0 %v1954_v1  ;;  %1776 = vmatpush3.bf16.msra.mxu1 %v1775_v13  ;;  %v1787_v51 = vpack.c.bf16 %v464_v49, %v463_v48  ;;  %v1790_v53 = vpack.c.bf16 %v466_v52, %v465_v50  ;;  %v467_v3 = vld [vmem:[#allocation7 + $0x98] sm:$0x1]  ;;  %v564_v4 = vld [vmem:[#allocation7 + $0xa0] sm:$0xff]  ;;  %v565_v5 = vld [vmem:[#allocation7 + $0xa8] sm:$0xff] }
  0x40   :  { %1557 = vmatprep.subr.mxu1 %v1954_v1  ;;  %v566_v6 = vld [vmem:[#allocation7 + $0xb0] sm:$0xff]  ;;  %v1793_v7 = vpack.c.bf16 %v565_v5, %v564_v4  ;;  %v567_v8 = vld [vmem:[#allocation7 + $0xb8] sm:$0xff]  ;;  %v865_v49 = vld [vmem:[#allocation7 + $0x108] sm:$0xff]  ;;  %p1927_p0 = pnand %p1926_p13, %p1920_p10 }
  0x41   :  { %v1796_v9 = vpack.c.bf16 %v567_v8, %v566_v6  ;;  %v963_v4 = vld [vmem:[#allocation7 + $0x118] sm:$0xff]  ;;  %v964_v5 = vld [vmem:[#allocation7 + $0x120] sm:$0xff]  ;;  %v965_v6 = vld [vmem:[#allocation7 + $0x128] sm:$0xff] }
  0x42   :  { %1539 = vmatpush3.msk.msra.mxu0 %vm74_vm1, %v63_v14  ;;  %v966_v8 = vld [vmem:[#allocation7 + $0x130] sm:$0xff] }
  0x43   :  { %1541 = vmatmul.mubr.msk.f32.vlgmr.msra.gmra.mrb[0].mxu0 %vm64_vm2, %v56_v15  ;;  %1777 = vmatprep.subr.bf16.mxu0 %v1952_v0 }
  0x44   :  { %1543 = vmatprep.mubr.msk.f32.mxu0 %vm1953_vm0, %v1954_v1  ;;  %1558 = vmatpush3.msk.msra.mxu1 %vm74_vm1, %v166_v18 }
  0x45   :  { %1780 = vmatprep.subr.bf16.mxu1 %v1952_v0 }
  0x47   :  { %1544 = vmatmul.mubr.msk.f32.gmra.mrb[2].mxu0 %vm64_vm2, %v57_v16 }
  0x48   :  { %1546 = vmatprep.mubr.msk.f32.mxu0 %vm1953_vm0, %v1954_v1 }
  0x4b   :  { %1547 = vmatmul.mubr.msk.f32.gmra.mrb[4].mxu0 %vm64_vm2, %v58_v17 }
  0x4c   :  { %1574 = vmatprep.mubr.msk.f32.mxu0 %vm1953_vm0, %v1954_v1 }
 0x116   :  { %v144_v19 = vpop.f32.mrb[0].mxu0 }
 0x117   :  { %v158_v20 = vmax.f32 %v144_v19, 0.0  ;;  %v1542_v21 = vpop.f32.mrb[1].mxu0  ;;  %v568_v19 = vld [vmem:[#allocation7 + $0xc0] sm:$0x1] }
 0x118   :  { %v666_v21 = vld [vmem:[#allocation7 + $0xd0] sm:$0xff] }
 0x119   :  { %1560 = vmatmul.mubr.msk.f32.vlgmr.msra.gmra.mrb[0].mxu1 %vm64_vm2, %v158_v20  ;;  %v665_v20 = vld [vmem:[#allocation7 + $0xc8] sm:$0xff] }
 0x11a   :  { %v149_v22 = vpop.f32.mrb[2].mxu0  ;;  %1562 = vmatprep.mubr.msk.f32.mxu1 %vm1953_vm0, %v1954_v1  ;;  %1782 = vmatpush3.bf16.msra.mxu1 %v1781_v31 }
 0x11b   :  { %v159_v23 = vmax.f32 %v149_v22, 0.0  ;;  %v1545_v24 = vpop.f32.mrb[3].mxu0  ;;  %1783 = vmatprep.subr.bf16.mxu1 %v1952_v0  ;;  %v667_v22 = vld [vmem:[#allocation7 + $0xd8] sm:$0xff] }
 0x11c   :  { %v668_v24 = vld [vmem:[#allocation7 + $0xe0] sm:$0xff] }
 0x11d   :  { %1563 = vmatmul.mubr.msk.f32.gmra.mrb[2].mxu1 %vm64_vm2, %v159_v23  ;;  %v1799_v23 = vpack.c.bf16 %v666_v21, %v665_v20  ;;  %v1064_v20 = vld [vmem:[#allocation7 + $0x140] sm:$0xff]  ;;  %v1065_v21 = vld [vmem:[#allocation7 + $0x148] sm:$0xff] }
 0x11e   :  { %v154_v25 = vpop.f32.mrb[4].mxu0  ;;  %1565 = vmatprep.mubr.msk.f32.mxu1 %vm1953_vm0, %v1954_v1  ;;  %1785 = vmatpush3.bf16.msra.mxu1 %v1784_v33 }
 0x11f   :  { %v160_v26 = vmax.f32 %v154_v25, 0.0  ;;  %v1548_v27 = vpop.f32.mrb[5].mxu0  ;;  %1591 = vmatprep.subr.mxu1 %v1954_v1  ;;  %v1802_v25 = vpack.c.bf16 %v668_v24, %v667_v22  ;;  %v1066_v22 = vld [vmem:[#allocation7 + $0x150] sm:$0xff]  ;;  %v1067_v24 = vld [vmem:[#allocation7 + $0x158] sm:$0xff] }
 0x121   :  { %1566 = vmatmul.mubr.msk.f32.gmra.mrb[4].mxu1 %vm64_vm2, %v160_v26 }
 0x122   :  { %1593 = vmatprep.mubr.msk.f32.mxu1 %vm1953_vm0, %v1954_v1  ;;  %1592 = vmatpush3.msk.msra.mxu1 %vm74_vm1, %v366_v47  ;;  %v864_v47 = vld [vmem:[#allocation7 + $0x100] sm:$0xff] }
 0x123   :  { %1792 = vmatprep.subr.bf16.mxu1 %v1952_v0  ;;  %v1811_v50 = vpack.c.bf16 %v865_v49, %v864_v47 }
 0x1ec   :  { %v245_v34 = vpop.f32.mrb[0].mxu1 }
 0x1ed   :  { %v1561_v35 = vpop.f32.mrb[1].mxu1  ;;  %v259_v37 = vmax.f32 %v245_v34, 0.0 }
 0x1ee   :  { %v669_v35 = vld [vmem:[#allocation7 + $0xe8] sm:$0x1] }
 0x1f0   :  { %v250_v36 = vpop.f32.mrb[2].mxu1 }
 0x1f1   :  { %v260_v38 = vmax.f32 %v250_v36, 0.0  ;;  %v1564_v39 = vpop.f32.mrb[3].mxu1 }
 0x1f3   :  { %v1778_v40 = vpack.c.bf16 %v260_v38, %v259_v37 }
 0x1f4   :  { %v255_v41 = vpop.f32.mrb[4].mxu1 }
 0x1f5   :  { %v261_v42 = vmax.f32 %v255_v41, 0.0  ;;  %1779 = vmatpush3.bf16.msra.mxu0 %v1778_v40  ;;  %v1567_v43 = vpop.f32.mrb[5].mxu1 }
 0x1f6   :  { %1572 = vmatprep.subr.mxu0 %v1954_v1 }
 0x1f9   :  { %1573 = vmatpush3.msra.mxu0 %v261_v42 }
 0x1fa   :  { %1575 = vmatmul.mubr.msk.f32.vlgmr.msra.gmra.mrb[6].mxu0 %vm265_vm3, %v262_v44  ;;  %1786 = vmatprep.subr.bf16.mxu0 %v1952_v0 }
 0x1fb   :  { %1577 = vmatprep.mubr.msk.f32.mxu0 %vm1953_vm0, %v1954_v1  ;;  %1788 = vmatpush3.bf16.msra.mxu0 %v1787_v51 }
 0x1fc   :  { %1789 = vmatprep.subr.bf16.mxu0 %v1952_v0 }
 0x1fe   :  { %1578 = vmatmul.mubr.msk.f32.gmra.mrb[8].mxu0 %vm265_vm3, %v263_v45  ;;  %v862_v45 = vld [vmem:[#allocation7 + $0xf0] sm:$0xff] }
 0x1ff   :  { %1580 = vmatprep.mubr.msk.f32.mxu0 %vm1953_vm0, %v1954_v1  ;;  %1791 = vmatpush3.bf16.msra.mxu0 %v1790_v53 }
 0x200   :  { %1610 = vmatprep.subr.mxu0 %v1954_v1 }
 0x202   :  { %1581 = vmatmul.mubr.msk.f32.gmra.mrb[10].mxu0 %vm265_vm3, %v264_v46  ;;  %v863_v46 = vld [vmem:[#allocation7 + $0xf8] sm:$0xff] }
 0x203   :  { %1612 = vmatprep.mubr.msk.f32.mxu0 %vm1953_vm0, %v1954_v1  ;;  %1611 = vmatpush3.msk.msra.mxu0 %vm74_vm1, %v467_v3  ;;  %v1808_v48 = vpack.c.bf16 %v863_v46, %v862_v45  ;;  %v866_v3 = vld [vmem:[#allocation7 + $0x110] sm:$0x1]  ;;  %v1260_v46 = vld [vmem:[#allocation7 + $0x178] sm:$0xff] }
 0x204   :  { %1798 = vmatprep.subr.bf16.mxu0 %v1952_v0  ;;  %v1259_v45 = vld [vmem:[#allocation7 + $0x170] sm:$0xff] }
 0x2cd   :  { %v341_v56 = vpop.f32.mrb[6].mxu0 }
 0x2ce   :  { %v358_v57 = vsel %vm357_vm4, 1.0, %v341_v56  ;;  %v1576_v58 = vpop.f32.mrb[7].mxu0 }
 0x2cf   :  { %1594 = vmatmul.mubr.msk.f32.vlgmr.msra.gmra.mrb[6].mxu1 %vm64_vm2, %v358_v57 }
 0x2d0   :  { %1596 = vmatprep.mubr.msk.f32.mxu1 %vm1953_vm0, %v1954_v1  ;;  %1794 = vmatpush3.bf16.msra.mxu1 %v1793_v7  ;;  %v1814_v7 = vpack.c.bf16 %v964_v5, %v963_v4 }
 0x2d1   :  { %v346_v59 = vpop.f32.mrb[8].mxu0  ;;  %1795 = vmatprep.subr.bf16.mxu1 %v1952_v0 }
 0x2d2   :  { %v359_v60 = vsel %vm357_vm4, 1.0, %v346_v59  ;;  %v1579_v61 = vpop.f32.mrb[9].mxu0 }
 0x2d3   :  { %1597 = vmatmul.mubr.msk.f32.gmra.mrb[8].mxu1 %vm64_vm2, %v359_v60 }
 0x2d4   :  { %1599 = vmatprep.mubr.msk.f32.mxu1 %vm1953_vm0, %v1954_v1  ;;  %1797 = vmatpush3.bf16.msra.mxu1 %v1796_v9  ;;  %v1817_v9 = vpack.c.bf16 %v966_v8, %v965_v6 }
 0x2d5   :  { %v351_v62 = vpop.f32.mrb[10].mxu0  ;;  %1629 = vmatprep.subr.mxu1 %v1954_v1 }
 0x2d6   :  { %v360_v63 = vsel %vm357_vm4, 1.0, %v351_v62  ;;  %v1582_v2 = vpop.f32.mrb[11].mxu0  ;;  %v766_v62 = vld [vmem:[#allocation5 + $0x18] sm:$0xff] }
 0x2d7   :  { %1600 = vmatmul.mubr.msk.f32.gmra.mrb[10].mxu1 %vm64_vm2, %v360_v63  ;;  %v767_v63 = vld [vmem:[#allocation5 + $0x20] sm:$0xff]  ;;  %v768_v2 = vld [vmem:[#allocation5 + $0x28] sm:$0xff] }
 0x2d8   :  { %1631 = vmatprep.mubr.msk.f32.mxu1 %vm1953_vm0, %v1954_v1  ;;  %1630 = vmatpush3.msk.msra.mxu1 %vm74_vm1, %v568_v19  ;;  %v967_v19 = vld [vmem:[#allocation7 + $0x138] sm:$0x1] }
 0x2d9   :  { %1804 = vmatprep.subr.bf16.mxu1 %v1952_v0 }
 0x3a2   :  { %v445_v10 = vpop.f32.mrb[6].mxu1 }
 0x3a3   :  { %v459_v11 = vmax.f32 %v445_v10, 0.0  ;;  %v1595_v12 = vpop.f32.mrb[7].mxu1 }
 0x3a5   :  { %1613 = vmatmul.mubr.msk.f32.vlgmr.msra.gmra.mrb[12].mxu0 %vm64_vm2, %v459_v11 }
 0x3a6   :  { %v450_v13 = vpop.f32.mrb[8].mxu1  ;;  %1615 = vmatprep.mubr.msk.f32.mxu0 %vm1953_vm0, %v1954_v1  ;;  %1800 = vmatpush3.bf16.msra.mxu0 %v1799_v23  ;;  %v1820_v23 = vpack.c.bf16 %v1065_v21, %v1064_v20 }
 0x3a7   :  { %v460_v14 = vmax.f32 %v450_v13, 0.0  ;;  %v1598_v15 = vpop.f32.mrb[9].mxu1  ;;  %1801 = vmatprep.subr.bf16.mxu0 %v1952_v0 }
 0x3a9   :  { %1616 = vmatmul.mubr.msk.f32.gmra.mrb[14].mxu0 %vm64_vm2, %v460_v14 }
 0x3aa   :  { %v455_v16 = vpop.f32.mrb[10].mxu1  ;;  %1618 = vmatprep.mubr.msk.f32.mxu0 %vm1953_vm0, %v1954_v1  ;;  %1803 = vmatpush3.bf16.msra.mxu0 %v1802_v25  ;;  %v1823_v25 = vpack.c.bf16 %v1067_v24, %v1066_v22 }
 0x3ab   :  { %v461_v17 = vmax.f32 %v455_v16, 0.0  ;;  %v1601_v18 = vpop.f32.mrb[11].mxu1  ;;  %1648 = vmatprep.subr.mxu0 %v1954_v1 }
 0x3ad   :  { %1619 = vmatmul.mubr.msk.f32.gmra.mrb[16].mxu0 %vm64_vm2, %v461_v17 }
 0x3ae   :  { %1650 = vmatprep.mubr.msk.f32.mxu0 %vm1953_vm0, %v1954_v1  ;;  %1649 = vmatpush3.msk.msra.mxu0 %vm74_vm1, %v669_v35 }
 0x3af   :  { %1807 = vmatprep.subr.bf16.mxu0 %v1952_v0 }
 0x478   :  { %v546_v26 = vpop.f32.mrb[12].mxu0 }
 0x479   :  { %v560_v27 = vmax.f32 %v546_v26, 0.0  ;;  %v1614_v28 = vpop.f32.mrb[13].mxu0 }
 0x47b   :  { %1632 = vmatmul.mubr.msk.f32.vlgmr.msra.gmra.mrb[12].mxu1 %vm64_vm2, %v560_v27 }
 0x47c   :  { %v551_v29 = vpop.f32.mrb[14].mxu0  ;;  %1634 = vmatprep.mubr.msk.f32.mxu1 %vm1953_vm0, %v1954_v1 }
 0x47d   :  { %v561_v30 = vmax.f32 %v551_v29, 0.0  ;;  %v1617_v31 = vpop.f32.mrb[15].mxu0 }
 0x47f   :  { %1635 = vmatmul.mubr.msk.f32.gmra.mrb[14].mxu1 %vm64_vm2, %v561_v30 }
 0x480   :  { %v556_v32 = vpop.f32.mrb[16].mxu0  ;;  %1637 = vmatprep.mubr.msk.f32.mxu1 %vm1953_vm0, %v1954_v1 }
 0x481   :  { %v562_v33 = vmax.f32 %v556_v32, 0.0  ;;  %v1620_v34 = vpop.f32.mrb[17].mxu0 }
 0x482   :  { %v1068_v34 = vld [vmem:[#allocation7 + $0x160] sm:$0x1] }
 0x483   :  { %1638 = vmatmul.mubr.msk.f32.gmra.mrb[16].mxu1 %vm64_vm2, %v562_v33 }
 0x484   :  { %1665 = vmatprep.mubr.msk.f32.mxu1 %vm1953_vm0, %v1954_v1 }
 0x54e   :  { %v647_v36 = vpop.f32.mrb[12].mxu1 }
 0x54f   :  { %v661_v37 = vmax.f32 %v647_v36, 0.0  ;;  %v1633_v38 = vpop.f32.mrb[13].mxu1 }
 0x551   :  { %1651 = vmatmul.mubr.msk.f32.vlgmr.msra.gmra.mrb[18].mxu0 %vm64_vm2, %v661_v37 }
 0x552   :  { %v652_v39 = vpop.f32.mrb[14].mxu1  ;;  %1653 = vmatprep.mubr.msk.f32.mxu0 %vm1953_vm0, %v1954_v1  ;;  %1809 = vmatpush3.bf16.msra.mxu0 %v1808_v48  ;;  %v1261_v48 = vld [vmem:[#allocation7 + $0x180] sm:$0xff] }
 0x553   :  { %v662_v40 = vmax.f32 %v652_v39, 0.0  ;;  %v1636_v41 = vpop.f32.mrb[15].mxu1  ;;  %1810 = vmatprep.subr.bf16.mxu0 %v1952_v0  ;;  %v1832_v49 = vpack.c.bf16 %v1261_v48, %v1260_v46 }
 0x555   :  { %1654 = vmatmul.mubr.msk.f32.gmra.mrb[20].mxu0 %vm64_vm2, %v662_v40 }
 0x556   :  { %v657_v42 = vpop.f32.mrb[16].mxu1  ;;  %1656 = vmatprep.mubr.msk.f32.mxu0 %vm1953_vm0, %v1954_v1  ;;  %1812 = vmatpush3.bf16.msra.mxu0 %v1811_v50 }
 0x557   :  { %v663_v43 = vmax.f32 %v657_v42, 0.0  ;;  %v1639_v44 = vpop.f32.mrb[17].mxu1  ;;  %1682 = vmatprep.subr.mxu0 %v1954_v1 }
 0x558   :  { %v1258_v44 = vld [vmem:[#allocation7 + $0x168] sm:$0xff] }
 0x559   :  { %1657 = vmatmul.mubr.msk.f32.gmra.mrb[22].mxu0 %vm64_vm2, %v663_v43  ;;  %v1829_v47 = vpack.c.bf16 %v1259_v45, %v1258_v44 }
 0x55a   :  { %1684 = vmatprep.mubr.msk.f32.mxu0 %vm1953_vm0, %v1954_v1  ;;  %1683 = vmatpush3.msk.msra.mxu0 %vm74_vm1, %v866_v3 }
 0x55b   :  { %1819 = vmatprep.subr.bf16.mxu0 %v1952_v0 }
 0x624   :  { %v748_v51 = vpop.f32.mrb[18].mxu0 }
 0x625   :  { %v1652_v52 = vpop.f32.mrb[19].mxu0  ;;  %v762_v54 = vmax.f32 %v748_v51, 0.0 }
 0x628   :  { %v753_v53 = vpop.f32.mrb[20].mxu0 }
 0x629   :  { %v763_v56 = vmax.f32 %v753_v53, 0.0  ;;  %v1655_v57 = vpop.f32.mrb[21].mxu0 }
 0x62b   :  { %v1805_v58 = vpack.c.bf16 %v763_v56, %v762_v54 }
 0x62c   :  { %v758_v59 = vpop.f32.mrb[22].mxu0 }
 0x62d   :  { %v764_v60 = vmax.f32 %v758_v59, 0.0  ;;  %1806 = vmatpush3.bf16.msra.mxu1 %v1805_v58  ;;  %v1658_v61 = vpop.f32.mrb[23].mxu0 }
 0x62e   :  { %1663 = vmatprep.subr.mxu1 %v1954_v1  ;;  %v1165_v61 = vld [vmem:[#allocation5 + $0x30] sm:$0xff] }
 0x631   :  { %1664 = vmatpush3.msra.mxu1 %v764_v60 }
 0x632   :  { %1666 = vmatmul.mubr.msk.f32.vlgmr.msra.gmra.mrb[18].mxu1 %vm265_vm3, %v766_v62  ;;  %1813 = vmatprep.subr.bf16.mxu1 %v1952_v0  ;;  %v1262_v62 = vld [vmem:[#allocation7 + $0x188] sm:$0x1] }
 0x633   :  { %1668 = vmatprep.mubr.msk.f32.mxu1 %vm1953_vm0, %v1954_v1  ;;  %1815 = vmatpush3.bf16.msra.mxu1 %v1814_v7 }
 0x634   :  { %1816 = vmatprep.subr.bf16.mxu1 %v1952_v0 }
 0x636   :  { %1669 = vmatmul.mubr.msk.f32.gmra.mrb[20].mxu1 %vm265_vm3, %v767_v63  ;;  %v1166_v63 = vld [vmem:[#allocation5 + $0x38] sm:$0xff] }
 0x637   :  { %1671 = vmatprep.mubr.msk.f32.mxu1 %vm1953_vm0, %v1954_v1  ;;  %1818 = vmatpush3.bf16.msra.mxu1 %v1817_v9 }
 0x638   :  { %1701 = vmatprep.subr.mxu1 %v1954_v1 }
 0x63a   :  { %1672 = vmatmul.mubr.msk.f32.gmra.mrb[22].mxu1 %vm265_vm3, %v768_v2  ;;  %v1167_v2 = vld [vmem:[#allocation5 + $0x40] sm:$0xff] }
 0x63b   :  { %1703 = vmatprep.mubr.msk.f32.mxu1 %vm1953_vm0, %v1954_v1  ;;  %1702 = vmatpush3.msk.msra.mxu1 %vm74_vm1, %v967_v19 }
 0x63c   :  { %1825 = vmatprep.subr.bf16.mxu1 %v1952_v0 }
 0x705   :  { %v844_v10 = vpop.f32.mrb[18].mxu1 }
 0x706   :  { %v858_v11 = vsel %vm357_vm4, 1.0, %v844_v10  ;;  %v1667_v12 = vpop.f32.mrb[19].mxu1 }
 0x707   :  { %1685 = vmatmul.mubr.msk.f32.vlgmr.msra.gmra.mrb[24].mxu0 %vm64_vm2, %v858_v11 }
 0x708   :  { %1687 = vmatprep.mubr.msk.f32.mxu0 %vm1953_vm0, %v1954_v1  ;;  %1821 = vmatpush3.bf16.msra.mxu0 %v1820_v23 }
 0x709   :  { %v849_v13 = vpop.f32.mrb[20].mxu1  ;;  %1822 = vmatprep.subr.bf16.mxu0 %v1952_v0 }
 0x70a   :  { %v859_v14 = vsel %vm357_vm4, 1.0, %v849_v13  ;;  %v1670_v15 = vpop.f32.mrb[21].mxu1 }
 0x70b   :  { %1688 = vmatmul.mubr.msk.f32.gmra.mrb[26].mxu0 %vm64_vm2, %v859_v14 }
 0x70c   :  { %1690 = vmatprep.mubr.msk.f32.mxu0 %vm1953_vm0, %v1954_v1  ;;  %1824 = vmatpush3.bf16.msra.mxu0 %v1823_v25 }
 0x70d   :  { %v854_v16 = vpop.f32.mrb[22].mxu1  ;;  %1720 = vmatprep.subr.mxu0 %v1954_v1 }
 0x70e   :  { %v860_v17 = vsel %vm357_vm4, 1.0, %v854_v16  ;;  %v1673_v18 = vpop.f32.mrb[23].mxu1 }
 0x70f   :  { %1691 = vmatmul.mubr.msk.f32.gmra.mrb[28].mxu0 %vm64_vm2, %v860_v17 }
 0x710   :  { %1722 = vmatprep.mubr.msk.f32.mxu0 %vm1953_vm0, %v1954_v1  ;;  %1721 = vmatpush3.msk.msra.mxu0 %vm74_vm1, %v1068_v34 }
 0x711   :  { %1828 = vmatprep.subr.bf16.mxu0 %v1952_v0 }
 0x7da   :  { %v945_v55 = vpop.f32.mrb[24].mxu0 }
 0x7db   :  { %v959_v26 = vmax.f32 %v945_v55, 0.0  ;;  %v1686_v27 = vpop.f32.mrb[25].mxu0 }
 0x7dd   :  { %1704 = vmatmul.mubr.msk.f32.vlgmr.msra.gmra.mrb[24].mxu1 %vm64_vm2, %v959_v26 }
 0x7de   :  { %v950_v28 = vpop.f32.mrb[26].mxu0  ;;  %1706 = vmatprep.mubr.msk.f32.mxu1 %vm1953_vm0, %v1954_v1 }
 0x7df   :  { %v960_v29 = vmax.f32 %v950_v28, 0.0  ;;  %v1689_v30 = vpop.f32.mrb[27].mxu0 }
 0x7e1   :  { %1707 = vmatmul.mubr.msk.f32.gmra.mrb[26].mxu1 %vm64_vm2, %v960_v29 }
 0x7e2   :  { %v955_v31 = vpop.f32.mrb[28].mxu0  ;;  %1709 = vmatprep.mubr.msk.f32.mxu1 %vm1953_vm0, %v1954_v1 }
 0x7e3   :  { %v961_v32 = vmax.f32 %v955_v31, 0.0  ;;  %v1692_v33 = vpop.f32.mrb[29].mxu0 }
 0x7e5   :  { %1710 = vmatmul.mubr.msk.f32.gmra.mrb[28].mxu1 %vm64_vm2, %v961_v32 }
 0x7e6   :  { %1737 = vmatprep.mubr.msk.f32.mxu1 %vm1953_vm0, %v1954_v1 }
 0x8b0   :  { %v1046_v35 = vpop.f32.mrb[24].mxu1 }
 0x8b1   :  { %v1060_v36 = vmax.f32 %v1046_v35, 0.0  ;;  %v1705_v37 = vpop.f32.mrb[25].mxu1 }
 0x8b3   :  { %1723 = vmatmul.mubr.msk.f32.vlgmr.msra.gmra.mrb[30].mxu0 %vm64_vm2, %v1060_v36 }
 0x8b4   :  { %v1051_v38 = vpop.f32.mrb[26].mxu1  ;;  %1725 = vmatprep.mubr.msk.f32.mxu0 %vm1953_vm0, %v1954_v1  ;;  %1830 = vmatpush3.bf16.msra.mxu0 %v1829_v47 }
 0x8b5   :  { %v1061_v39 = vmax.f32 %v1051_v38, 0.0  ;;  %v1708_v40 = vpop.f32.mrb[27].mxu1  ;;  %1831 = vmatprep.subr.bf16.mxu0 %v1952_v0 }
 0x8b7   :  { %1726 = vmatmul.mubr.msk.f32.gmra.mrb[32].mxu0 %vm64_vm2, %v1061_v39 }
 0x8b8   :  { %v1056_v41 = vpop.f32.mrb[28].mxu1  ;;  %1728 = vmatprep.mubr.msk.f32.mxu0 %vm1953_vm0, %v1954_v1  ;;  %1833 = vmatpush3.bf16.msra.mxu0 %v1832_v49 }
 0x8b9   :  { %v1062_v42 = vmax.f32 %v1056_v41, 0.0  ;;  %v1711_v43 = vpop.f32.mrb[29].mxu1  ;;  %1754 = vmatprep.subr.mxu0 %v1954_v1 }
 0x8bb   :  { %1729 = vmatmul.mubr.msk.f32.gmra.mrb[34].mxu0 %vm64_vm2, %v1062_v42 }
 0x8bc   :  { %1756 = vmatprep.mubr.msk.f32.mxu0 %vm1953_vm0, %v1954_v1  ;;  %1755 = vmatpush3.msk.msra.mxu0 %vm74_vm1, %v1262_v62 }
 0x986   :  { %v1147_v50 = vpop.f32.mrb[30].mxu0 }
 0x987   :  { %v1724_v51 = vpop.f32.mrb[31].mxu0  ;;  %v1161_v53 = vmax.f32 %v1147_v50, 0.0 }
 0x98a   :  { %v1152_v52 = vpop.f32.mrb[32].mxu0 }
 0x98b   :  { %v1162_v54 = vmax.f32 %v1152_v52, 0.0  ;;  %v1727_v56 = vpop.f32.mrb[33].mxu0 }
 0x98d   :  { %v1826_v57 = vpack.c.bf16 %v1162_v54, %v1161_v53 }
 0x98e   :  { %v1157_v58 = vpop.f32.mrb[34].mxu0 }
 0x98f   :  { %1827 = vmatpush3.bf16.msra.mxu1 %v1826_v57  ;;  %v1163_v59 = vmax.f32 %v1157_v58, 0.0  ;;  %v1730_v60 = vpop.f32.mrb[35].mxu0 }
 0x990   :  { %1735 = vmatprep.subr.mxu1 %v1954_v1 }
 0x993   :  { %1736 = vmatpush3.msra.mxu1 %v1163_v59 }
 0x994   :  { %1738 = vmatmul.mubr.msk.f32.vlgmr.msra.gmra.mrb[30].mxu1 %vm265_vm3, %v1165_v61  ;;  %1834 = vmatprep.subr.bf16.mxu1 %v1952_v0 }
 0x995   :  { %1740 = vmatprep.mubr.msk.f32.mxu1 %vm1953_vm0, %v1954_v1  ;;  %1837 = vmatpush3.bf16.msra.mxu1 %v1829_v47 }
 0x996   :  { %1835 = vmatprep.subr.bf16.mxu1 %v1952_v0 }
 0x998   :  { %1741 = vmatmul.mubr.msk.f32.gmra.mrb[32].mxu1 %vm265_vm3, %v1166_v63 }
 0x999   :  { %1838 = vmatpush3.bf16.msra.mxu1 %v1832_v49  ;;  %1743 = vmatprep.mubr.msk.f32.mxu1 %vm1953_vm0, %v1954_v1 }
 0x99a   :  { %1836 = vmatprep.subr.mxu1 %v1954_v1 }
 0x99c   :  { %1744 = vmatmul.mubr.msk.f32.gmra.mrb[34].mxu1 %vm265_vm3, %v1167_v2 }
 0x99d   :  { %1839 = vmatpush3.msk.msra.mxu1 %vm74_vm1, %v1262_v62  ;;  %1759 = vmatprep.mubr.msk.f32.mxu1 %vm1953_vm0, %v1954_v1 }
 0xa67   :  { %v1243_v0 = vpop.f32.mrb[30].mxu1 }
 0xa68   :  { %1757 = vmatmul.mubr.msk.f32.vlgmr.msra.gmra.mrb[36].mxu0 %vm64_vm2, %v1243_v0  ;;  %v1739_v3 = vpop.f32.mrb[31].mxu1 }
 0xa6b   :  { %v1248_v4 = vpop.f32.mrb[32].mxu1 }
 0xa6c   :  { %v1742_v5 = vpop.f32.mrb[33].mxu1  ;;  %1760 = vmatmul.mubr.msk.f32.vlgmr.msra.gmra.mrb[36].mxu1 %vm64_vm2, %v1248_v4 }
 0xa6d   :  { %1762 = vmatprep.mubr.msk.f32.mxu1 %vm1953_vm0, %v1954_v1 }
 0xa6f   :  { %v1253_v6 = vpop.f32.mrb[34].mxu1 }
 0xa70   :  { %v1745_v7 = vpop.f32.mrb[35].mxu1  ;;  %1763 = vmatmul.mubr.msk.f32.gmra.mrb[38].mxu1 %vm64_vm2, %v1253_v6 }
 0xb3b   :  { %v1341_v8 = vpop.f32.mrb[36].mxu0 }
 0xb3c   :  { %v1354_v9 = vsel %vm1353_vm5, %v1341_v8, -inf  ;;  %v1758_v10 = vpop.f32.mrb[37].mxu0 }
 0xb3d   :  { %1355 = vmax.xlane.f32.xlu0 %v1354_v9 }
 0xb3f   :  { %v1346_v11 = vpop.f32.mrb[36].mxu1 }
 0xb40   :  { %v1761_v12 = vpop.f32.mrb[37].mxu1 }
 0xb43   :  { %v1350_v13 = vpop.f32.mrb[38].mxu1 }
 0xb44   :  { %v1764_v14 = vpop.f32.mrb[39].mxu1 }
 0xbca   :  { %v1356_v15 = vpop.xlane.xlu0 %1355 }
 0xbcb   :  { %v1357_v16 = vsub.f32 %v1341_v8, %v1356_v15 }
 0xbcd   :  { %v1358_v17 = vmul.f32 1.442695, %v1357_v16 }
 0xbcf   :  { %1849 = vpow2.f32 %v1358_v17 }
 0xbd9   :  { %v1850_v18 = vpop.eup %1849 }
 0xbda   :  { %v1360_v1 = vsel %vm1353_vm5, %v1850_v18, 0.0 }
 0xbdb   :  { %1361 = vadd.xlane.f32.xlu0 %v1360_v1 }
 0xc68   :  { %v1362_v19 = vpop.xlane.xlu0 %1361 }
 0xc69   :  { %1851 = vlog2.f32 %v1362_v19 }
 0xc73   :  { %v1852_v20 = vpop.eup %1851 }
 0xc74   :  { %v1364_v21 = vmul.f32 0.6931472, %v1852_v20 }
 0xc76   :  { %v1365_v22 = vsub.f32 %v1357_v16, %v1364_v21 }
 0xc78   :  { %1366 = vst.msk [vmem:[#allocation8] sm:$0x7] %vm1353_vm5, %v1365_v22 }
 0xc79   :  { %1930 = shalt.err (!%p1927_p0)
}
 0xc7a   :  { %s1931_s25 = scalar_lea.hbm %s2228_s3, 64 }
 0xc7b   :  { %p1932_p1 = scmp.ne.s32.totalorder %s2228_s3, %s1931_s25  ;;  %p1935_p2 = scmp.lt.u32.totalorder %s1931_s25, %s2228_s3 }
 0xc7d   :  { %p1937_p3 = pnand %p1935_p2, %p1932_p1 }
 0xc7f   :  { %1940 = shalt.err (!%p1937_p3)
}
 0xc80   :  { %1376 = dma.vmem_to_hbm [thread:$0]  %s1374_s21, 64, %s2228_s3, [#allocation4]  }
 0xc81   :  { %1945 = dma.done.wait [#allocation4], 64  }
 0xc82   :  { %1946 = vsyncadd [#allocation4], 4294967232 }
 0xc83   :  { %1380 = vsyncpa [#allocation3], 1 }
 0xc84   :  { %1381 = vsyncpa [#allocation6], 1 }
 0xc85   :  { %1382 = vsyncpa [#allocation4], 1 }

</bundles_post_ra>
